<compile_context>
chip_gen: v6e
topology: v6e:2x2x1
jax: 0.10.0
libtpu: 0.0.40
codegen_flags: <defaults>
</compile_context>

<pallas_src>
import functools
import math

import jax
import jax.numpy as jnp
from jax import lax
from jax.experimental import pallas as pl
from jax.experimental.pallas import tpu as pltpu


def _round_up(x, m):
    return ((x + m - 1) // m) * m


def _cdiv(a, b):
    return -(-a // b)


# ---------------------------------------------------------------------------
# Pallas kernel: one (TM, K) x (K, TE) tile of the patch projection
# ---------------------------------------------------------------------------
def _projection_kernel(p_ref, w_ref, b_ref, o_ref):
    # p_ref: (TM, K)     streamed patch rows (mxu dtype, typically bf16)
    # w_ref: (K, TE)     resident (or E-tiled) weight
    # b_ref: (1, TE)     f32 bias
    # o_ref: (TM, TE)    output tile (lane-dense: TE multiple of 128)
    acc = jnp.dot(p_ref[...], w_ref[...], preferred_element_type=jnp.float32)
    o_ref[...] = (acc + b_ref[...]).astype(o_ref.dtype)


# ---------------------------------------------------------------------------
# Hardware-aware tile selection
# ---------------------------------------------------------------------------
def _tpu_generation():
    try:
        kind = jax.devices()[0].device_kind.lower()
    except Exception:
        return None
    if "v5 lite" in kind or "v5e" in kind or "v5litepod" in kind:
        return "v5e"
    if "v6" in kind:
        return "v6e"
    if "v7" in kind:
        return "v7x"
    return None


def _choose_tiles(M, K, E_pad, in_bytes, out_bytes, gen):
    """Pick (TM, TE, vmem_limit_bytes) for the projection matmul."""
    if gen in ("v5e", "v6e"):
        budget, vmem_limit, tm_cap = 80 << 20, 100 << 20, 2048   # 128 MiB VMEM
    elif gen == "v7x":
        budget, vmem_limit, tm_cap = 40 << 20, 48 << 20, 1024    # 64 MiB VMEM
    else:
        budget, vmem_limit, tm_cap = 24 << 20, None, 1024        # conservative

    # Tile E only when it is very wide; otherwise the weight stays resident.
    TE = E_pad if E_pad <= 2048 else 1024

    # Double-buffered weight + bias footprint (conservative).
    resident = 2 * K * TE * in_bytes + 2 * TE * 4

    def fits(tm):
        per_tile = 2 * tm * K * in_bytes + 2 * tm * TE * out_bytes
        return resident + per_tile <= budget

    if M <= 8:
        tm = M                                  # full-dim block (exempt from /8 rule)
    else:
        tm = min(tm_cap, _round_up(min(M, tm_cap), 16))
        if tm >= 256:
            tm = (tm // 256) * 256              # full-width MXU passes on v6e/v7x
        while tm > 16 and not fits(tm):
            tm = tm - 256 if tm > 256 else max(16, (tm // 2) // 16 * 16)
        # Two (or more) grid steps so the "parallel" M axis spans both
        # TensorCores on v7x (and megacore parts); skip on single-TC v5e/v6e.
        if gen not in ("v5e", "v6e") and M >= 512:
            tm = min(tm, max(256, _round_up(_cdiv(M, 2), 256)))
    return tm, TE, vmem_limit


# ---------------------------------------------------------------------------
# im2col glue (plain JAX). stride == patch -> one fused layout/convert pass.
# ---------------------------------------------------------------------------
def _im2col(x, patch, stride, dtype):
    N, C, H, W = x.shape
    P, S = patch, stride
    Ho = (H - P) // S + 1
    Wo = (W - P) // S + 1
    if S == P and H == Ho * P and W == Wo * P:
        # Non-overlapping patches: pure layout transform, fused with the cast.
        patches = (x.reshape(N, C, Ho, P, Wo, P)
                     .transpose(0, 2, 4, 1, 3, 5)
                     .reshape(N * Ho * Wo, C * P * P)
                     .astype(dtype))
    else:
        # General (overlapping / non-divisible) case: single patches op whose
        # feature order is (C, kh, kw), matching weight.reshape(E, C*P*P).
        cols = lax.conv_general_dilated_patches(
            x, (P, P), (S, S), padding="VALID",
            dimension_numbers=("NCHW", "OIHW", "NCHW"))
        patches = (cols.transpose(0, 2, 3, 1)
                       .reshape(N * Ho * Wo, C * P * P)
                       .astype(dtype))
    return patches, Ho, Wo


# ---------------------------------------------------------------------------
# Parameter preparation (done ONCE, outside the per-call forward path)
# ---------------------------------------------------------------------------
def prepare_projection_params(weight, bias, mxu_dtype=jnp.bfloat16):
    """weight: (E, C, P, P), bias: (E,) -> (w_mat (K, E_pad), b_mat (1, E_pad)).

    Use mxu_dtype=jnp.float32 for exact f32 parity with PyTorch Conv2d."""
    E, C, P, _ = weight.shape
    K = C * P * P
    E_pad = _round_up(E, 128)       # lane-dense output stores
    w_mat = jnp.zeros((K, E_pad), mxu_dtype).at[:, :E].set(
        weight.reshape(E, K).T.astype(mxu_dtype))
    b_mat = jnp.zeros((1, E_pad), jnp.float32).at[:, :E].set(
        bias.astype(jnp.float32).reshape(1, E))
    return w_mat, b_mat


# ---------------------------------------------------------------------------
# Forward pass (equivalent to ImagePatchEmbedding.forward)
# ---------------------------------------------------------------------------
@functools.partial(
    jax.jit,
    static_argnames=("patch_size", "stride", "embedding_size",
                     "output_format", "out_dtype"))
def patch_embedding_apply(x, w_mat, b_mat, *, patch_size, stride,
                          embedding_size, output_format="NCHW",
                          out_dtype=None):
    """x: (N, C, H, W) -> (N, E, Ho, Wo) ("NCHW") or (N, Ho*Wo, E) ("NLC")."""
    N, C, H, W = x.shape
    K, E_pad = w_mat.shape
    E = embedding_size
    assert K == C * patch_size * patch_size

    mxu_dtype = w_mat.dtype
    patches, Ho, Wo = _im2col(x, patch_size, stride, mxu_dtype)   # (M, K)
    M = patches.shape[0]

    out_dtype = x.dtype if out_dtype is None else out_dtype
    in_bytes = jnp.dtype(mxu_dtype).itemsize
    out_bytes = jnp.dtype(out_dtype).itemsize

    gen = _tpu_generation()
    TM, TE, vmem_limit = _choose_tiles(M, K, E_pad, in_bytes, out_bytes, gen)
    grid_m = _cdiv(M, TM)
    grid_e = _cdiv(E_pad, TE)

    cost = pl.CostEstimate(
        flops=2 * M * K * E_pad,
        transcendentals=0,
        bytes_accessed=(M * K * in_bytes + K * E_pad * in_bytes
                        + E_pad * 4 + M * E_pad * out_bytes),
    )

    out_flat = pl.pallas_call(
        _projection_kernel,
        out_shape=jax.ShapeDtypeStruct((M, E_pad), out_dtype),
        grid=(grid_m, grid_e),
        in_specs=[
            pl.BlockSpec((TM, K), lambda i, j: (i, 0)),    # streamed patch rows
            pl.BlockSpec((K, TE), lambda i, j: (0, j)),    # resident / E-tiled weight
            pl.BlockSpec((1, TE), lambda i, j: (0, j)),    # bias
        ],
        out_specs=pl.BlockSpec((TM, TE), lambda i, j: (i, j)),
        compiler_params=pltpu.CompilerParams(
            dimension_semantics=("parallel", "parallel"),
            vmem_limit_bytes=vmem_limit),
        cost_estimate=cost,
    )(patches, w_mat, b_mat)

    tokens = out_flat[:, :E]                               # (M, E), M unpadded
    if output_format == "NLC":
        return tokens.reshape(N, Ho * Wo, E)
    # TODO(synk): consumers that accept (N, Ho*Wo, E) tokens should use
    # output_format="NLC" and skip this extra NCHW transpose pass.
    return tokens.reshape(N, Ho, Wo, E).transpose(0, 3, 1, 2)


def image_patch_embedding_forward(x, weight, bias, *, stride,
                                  output_format="NCHW", out_dtype=None,
                                  mxu_dtype=jnp.bfloat16):
    """Convenience wrapper taking raw Conv2d params (prep not hoisted)."""
    E, _, P, _ = weight.shape
    w_mat, b_mat = prepare_projection_params(weight, bias, mxu_dtype=mxu_dtype)
    return patch_embedding_apply(x, w_mat, b_mat, patch_size=P, stride=stride,
                                 embedding_size=E, output_format=output_format,
                                 out_dtype=out_dtype)


# ---------------------------------------------------------------------------
# Deterministic parameter init (shapes per nn.Conv2d(in_channels, E, P, stride))
# ---------------------------------------------------------------------------
def init_params(key, in_channels, patch_size, embedding_size, dtype=jnp.float32):
    kw_key, kb_key = jax.random.split(key)
    fan_in = in_channels * patch_size * patch_size
    bound = 1.0 / math.sqrt(fan_in)  # matches PyTorch Conv2d default init bounds
    weight = jax.random.uniform(
        kw_key, (embedding_size, in_channels, patch_size, patch_size),
        minval=-bound, maxval=bound, dtype=dtype)
    bias = jax.random.uniform(
        kb_key, (embedding_size,), minval=-bound, maxval=bound, dtype=dtype)
    return weight, bias


if __name__ == "__main__":
    # Small shapes consistent with the module: batch=2, channels=4, 16x16 image,
    # patch_size=4, stride=4, embedding_size=32.
    N, C, H, W = 2, 4, 16, 16
    PATCH, STRIDE, EMB = 4, 4, 32

    key = jax.random.PRNGKey(0)
    kx, kp = jax.random.split(key)
    x = jax.random.normal(kx, (N, C, H, W), dtype=jnp.float32)
    weight, bias = init_params(kp, C, PATCH, EMB)

    # Parameter prep (transpose / pad / bf16 cast) hoisted out of the forward.
    w_mat, b_mat = prepare_projection_params(weight, bias)
    out = patch_embedding_apply(x, w_mat, b_mat, patch_size=PATCH,
                                stride=STRIDE, embedding_size=EMB)
    out = jax.block_until_ready(out)

    # Reference: same bf16-rounded operands through XLA's conv with f32
    # accumulation, so the only delta vs. the kernel is summation order.
    x_q = x.astype(jnp.bfloat16).astype(jnp.float32)
    w_q = weight.astype(jnp.bfloat16).astype(jnp.float32)
    ref = lax.conv_general_dilated(
        x_q, w_q, window_strides=(STRIDE, STRIDE), padding="VALID",
        dimension_numbers=("NCHW", "OIHW", "NCHW"),
        precision=lax.Precision.HIGHEST,
    ) + bias.reshape(1, EMB, 1, 1)
    ref = jax.block_until_ready(ref)

    Ho = (H - PATCH) // STRIDE + 1
    Wo = (W - PATCH) // STRIDE + 1
    assert out.shape == (N, EMB, Ho, Wo), out.shape
    max_err = float(jnp.max(jnp.abs(out - ref)))
    assert max_err < 1e-3, max_err
    print("KERNEL_OK")
</pallas_src>

<mosaic_0001>
module attributes {stable_mosaic.version = 11 : i64} {
  func.func @_projection_kernel(%arg0: i32, %arg1: i32, %arg2: memref<32x64xbf16, #tpu.memory_space<vmem>>, %arg3: memref<64x128xbf16, #tpu.memory_space<vmem>>, %arg4: memref<1x128xf32, #tpu.memory_space<vmem>>, %arg5: memref<32x128xf32, #tpu.memory_space<vmem>>) attributes {dimension_semantics = [#tpu.dimension_semantics<parallel>, #tpu.dimension_semantics<parallel>], iteration_bounds = array<i64: 1, 1>, scalar_prefetch = 0 : i64, scratch_operands = 0 : i64, tpu.core_type = #tpu.core_type<tc>, window_params = [{transform_indices = @transform_0, window_bounds = array<i64: 32, 64>}, {transform_indices = @transform_1, window_bounds = array<i64: 64, 128>}, {transform_indices = @transform_2, window_bounds = array<i64: 1, 128>}, {transform_indices = @transform_3, window_bounds = array<i64: 32, 128>}]} {
    %c0 = arith.constant 0 : index
    %c0_0 = arith.constant 0 : index
    %0 = vector.load %arg2[%c0, %c0_0] : memref<32x64xbf16, #tpu.memory_space<vmem>>, vector<32x64xbf16>
    %c0_1 = arith.constant 0 : index
    %c0_2 = arith.constant 0 : index
    %1 = vector.load %arg3[%c0_1, %c0_2] : memref<64x128xbf16, #tpu.memory_space<vmem>>, vector<64x128xbf16>
    %cst = arith.constant dense<0.000000e+00> : vector<32x128xf32>
    %2 = tpu.matmul %0, %1, %cst {dimension_numbers = #tpu.dot_dimension_numbers<[1], [0], [0], [1], [0, 0, 1, 1], [], []>} : vector<32x64xbf16>, vector<64x128xbf16>, vector<32x128xf32> -> vector<32x128xf32>
    %c0_3 = arith.constant 0 : index
    %c0_4 = arith.constant 0 : index
    %3 = vector.load %arg4[%c0_3, %c0_4] : memref<1x128xf32, #tpu.memory_space<vmem>>, vector<1x128xf32>
    %4 = vector.broadcast %3 : vector<1x128xf32> to vector<32x128xf32>
    %5 = arith.addf %2, %4 : vector<32x128xf32>
    %c0_5 = arith.constant 0 : index
    %c0_6 = arith.constant 0 : index
    %6 = vector.load %arg5[%c0_5, %c0_6] : memref<32x128xf32, #tpu.memory_space<vmem>>, vector<32x128xf32>
    tpu.vector_store %arg5[%c0_5, %c0_6], %5 {strides = array<i32>} : memref<32x128xf32, #tpu.memory_space<vmem>>, vector<32x128xf32>,
    return
  }
  func.func @transform_0(%arg0: i32, %arg1: i32) -> (i32, i32) {
    %c0_i32 = arith.constant 0 : i32
    %c0_i32_0 = arith.constant 0 : i32
    return %arg0, %c0_i32 : i32, i32
  }
  func.func @transform_1(%arg0: i32, %arg1: i32) -> (i32, i32) {
    %c0_i32 = arith.constant 0 : i32
    %c0_i32_0 = arith.constant 0 : i32
    return %c0_i32, %arg1 : i32, i32
  }
  func.func @transform_2(%arg0: i32, %arg1: i32) -> (i32, i32) {
    %c0_i32 = arith.constant 0 : i32
    %c0_i32_0 = arith.constant 0 : i32
    return %c0_i32, %arg1 : i32, i32
  }
  func.func @transform_3(%arg0: i32, %arg1: i32) -> (i32, i32) {
    %c0_i32 = arith.constant 0 : i32
    return %arg0, %arg1 : i32, i32
  }
}

</mosaic_0001>

<bundles_post_ra>
// kernel: patch_embedding_apply.1
= control target key start
LH: loop header
LB: loop body
LE: loop exit
PB: predicated region body
PF: predicated region fallthrough
CT: control target
= control target key end

     0   :  { %vm69_vm0 = vcmask 523264   ;;  %s250_s0 = inlined_call_operand.vmem [shape: bf16[32,64], index: 0, kind: input, shape index: {}]   ;;  %s251_s1 = inlined_call_operand.vmem [shape: bf16[64,128], index: 1, kind: input, shape index: {}]   ;;  %s252_s2 = inlined_call_operand.vmem [shape: f32[1,128], index: 2, kind: input, shape index: {}]   ;;  %s253_s3 = inlined_call_operand.hbm [shape: f32[32,128], index: 3, kind: output, shape index: {}]  }
   0x1   :  { %v175_v0 = vld [vmem:[%s251_s1 + $0x18] sm:$0xff]   ;;  %v176_v1 = vld [vmem:[%s251_s1 + $0x10] sm:$0xff]   ;;  %v177_v2 = vld [vmem:[%s251_s1 + $0x8] sm:$0xff]  }
   0x2   :  { %160 = vmatprep.subr.bf16.mxu0 %v175_v0  ;;  %v179_v3 = vld [vmem:[%s250_s0] sm:$0xff]  }
   0x3   :  { %161 = vmatpush3.bf16.msra.mxu0 %v175_v0  ;;  %168 = vmatprep.mubr.msk.bf16.mxu0 %vm69_vm0, %v179_v3 }
   0x4   :  { %162 = vmatprep.subr.bf16.mxu0 %v176_v1 }
   0x5   :  { %8 = vsyncpa [#allocation3], 0  ;;  %v178_v4 = vld [vmem:[%s251_s1] sm:$0xff]   ;;  %v180_v5 = vld [vmem:[%s250_s0 + $0x8] sm:$0xff]   ;;  %s203_s26 = smov [#allocation2]  }
   0x6   :  { %v145_v6 = vld [vmem:[%s252_s2] ss:$0 sm:$0xff]  ;;  %s134_s27 = sshll.u32 %s203_s26, 4  ;;  %s135_s27 = int_to_ptr.vmem [resolvable:$true] %s134_s27 }
   0x7   :  { %163 = vmatpush3.bf16.msra.mxu0 %v176_v1  ;;  %s181_s0 = scalar_lea.vmem %s135_s27, 512  ;;  %p186_p1 = scmp.lt.s32.totalorder %s135_s27, %s135_s27 }
   0x8   :  { %164 = vmatprep.subr.bf16.mxu0 %v177_v2  ;;  %p182_p0 = scmp.ne.s32.totalorder %s135_s27, %s181_s0  ;;  %p187_p2 = scmp.lt.s32.totalorder %s181_s0, %s181_s0 }
   0xa   :  { %p188_p3 = por %p187_p2, %p186_p1 }
   0xb   :  { %165 = vmatpush3.bf16.msra.mxu0 %v177_v2 }
   0xc   :  { %166 = vmatprep.subr.bf16.mxu0 %v178_v4  ;;  %p189_p4 = pnand %p188_p3, %p182_p0 }
   0xf   :  { %167 = vmatpush3.bf16.msra.mxu0 %v178_v4 }
  0x12   :  { %169 = vmatmul.mubr.msk.bf16.vlgmr.msra.gmra.mxu0 %vm69_vm0, %v180_v5 }
  0xd2   :  { %v170_v7 = vpop.f32.mrf.mxu0 }
  0xd3   :  { %v119_v8 = vadd.f32 %v170_v7, %v145_v6 }
  0xd4   :  { %v110_v9 = vpop.f32.mrf.mxu0 }
  0xd5   :  { %127 = vst [vmem:[#allocation2 + $0x10] sm:$0xff] %v119_v8  ;;  %v111_v10 = vadd.f32 %v145_v6, %v110_v9 }
  0xd6   :  { %v171_v11 = vpop.f32.mrf.mxu0 }
  0xd7   :  { %125 = vst [vmem:[#allocation2] sm:$0xff] %v111_v10  ;;  %v122_v12 = vadd.f32 %v171_v11, %v145_v6 }
  0xd8   :  { %v113_v13 = vpop.f32.mrf.mxu0 }
  0xd9   :  { %128 = vst [vmem:[#allocation2 + $0x18] sm:$0xff] %v122_v12  ;;  %v114_v14 = vadd.f32 %v145_v6, %v113_v13 }
  0xdb   :  { %126 = vst [vmem:[#allocation2 + $0x8] sm:$0xff] %v114_v14 }
  0xdc   :  { %192 = shalt.err (!%p189_p4)
}
  0xdd   :  { %s204_s1 = smov 128   ;;  %s205_s2 = smov 8  }
  0xde   :  { %140 = dma.vmem_to_hbm [thread:$0]  %s135_s27, 512, %s253_s3, [#allocation3], %s204_s1, %s204_s1, %s205_s2  }
  0xdf   :  { %201 = dma.done.wait [#allocation3], 512  }
  0xe0   :  { %202 = vsyncadd [#allocation3], 4294966784 }
  0xe1   :  { %144 = vsyncpa [#allocation3], 1 }

</bundles_post_ra>
